<compile_context>
chip_gen: v6e
topology: v6e:2x2x1
jax: 0.10.0
libtpu: 0.0.40
codegen_flags: <defaults>
</compile_context>

<pallas_src>
import functools

import jax
import jax.numpy as jnp
from jax.experimental import pallas as pl
from jax.experimental.pallas import tpu as pltpu


GAMMA = 2.0           # static -> pt**GAMMA specialised to pt*pt
ALPHA = 0.5           # static -> 2*(ALPHA*t + (1-ALPHA)*(1-t)) == 1 exactly
LOSS_WEIGHT = 1.0

_VMEM_LIMIT = 32 * 1024 * 1024      # explicit, v7x-safe scoped VMEM budget
_STREAM_BUDGET = 24 * 1024 * 1024   # budget for the double-buffered stream tiles


def _round_up(x, m):
    return ((x + m - 1) // m) * m


def _focal_elem(pred, tgt):
    """2 * sigmoid_focal_loss(pred, tgt, gamma=2, alpha=0.5), elementwise, f32.

    One shared exp() feeds both the sigmoid and the numerically-stable
    BCE-with-logits (2 EUP transcendentals per element). The sigmoid's divide is
    an EUP approx reciprocal refined by two Newton steps: d = 1+e is in [1, 2],
    so two steps recover full f32 accuracy regardless of vrcp's raw precision.
    """
    x = pred.astype(jnp.float32)
    t = tgt.astype(jnp.float32)
    e = jnp.exp(-jnp.abs(x))                              # EUP op 1
    d = 1.0 + e
    inv = pl.reciprocal(d, approx=True)                   # EUP vrcp (idle slot)
    inv = inv * (2.0 - d * inv)                           # Newton step 1
    inv = inv * (2.0 - d * inv)                           # Newton step 2 (~f32 exact)
    p = jnp.where(x >= 0, inv, e * inv)                   # sigmoid(x)
    pt = (1.0 - p) * t + p * (1.0 - t)
    bce = jnp.maximum(x, 0.0) - x * t + jnp.log1p(e)      # EUP op 2
    # alpha == 0.5  =>  2 * (alpha*t + (1-alpha)*(1-t)) == 1
    return pt * pt * bce


# ---------------- kernels -----------------------------------------------------

def _sum_kernel(n, tile_n, needs_mask, pred_ref, tgt_ref, psum_ref):
    loss = _focal_elem(pred_ref[...], tgt_ref[...])            # (tile_n, C) f32
    per_row = jnp.sum(loss, axis=1, keepdims=True)             # (tile_n, 1)
    if needs_mask:
        rows = (pl.program_id(0) * tile_n
                + jax.lax.broadcasted_iota(jnp.int32, (tile_n, 1), 0))
        per_row = jnp.where(rows < n, per_row, 0.0)            # drop garbage edge rows
    psum_ref[...] = jnp.broadcast_to(jnp.sum(per_row), psum_ref.shape)


def _sum_kernel_w(n, tile_n, needs_mask, pred_ref, tgt_ref, w_ref, psum_ref):
    loss = _focal_elem(pred_ref[...], tgt_ref[...])            # (tile_n, C) f32
    # weight applied AFTER the class reduction: tile_n muls, no lane broadcast
    per_row = jnp.sum(loss, axis=1, keepdims=True) * w_ref[...].astype(jnp.float32)
    if needs_mask:
        rows = (pl.program_id(0) * tile_n
                + jax.lax.broadcasted_iota(jnp.int32, (tile_n, 1), 0))
        per_row = jnp.where(rows < n, per_row, 0.0)
    psum_ref[...] = jnp.broadcast_to(jnp.sum(per_row), psum_ref.shape)


def _elem_kernel(pred_ref, tgt_ref, out_ref):
    # edge-block OOB rows are dropped by Pallas' masked stores -> no masking needed
    out_ref[...] = _focal_elem(pred_ref[...], tgt_ref[...])


def _elem_kernel_w(pred_ref, tgt_ref, w_ref, out_ref):
    out_ref[...] = (_focal_elem(pred_ref[...], tgt_ref[...])
                    * w_ref[...].astype(jnp.float32))


# ---------------- wrapper ------------------------------------------------------

def _row_align(*dtypes):
    """Min row multiple so every stream respects its dtype's sublane min-tile."""
    a = 8
    for dt in dtypes:
        a = max(a, 32 // max(jnp.dtype(dt).itemsize, 1))   # f32->8, bf16->16, i8->32
    return a


def _pick_tile_n(n, per_row_bytes, row_align):
    """Largest row tile that keeps double-buffered streams under the budget."""
    cap = max(_STREAM_BUDGET // max(2 * per_row_bytes, 1), row_align)
    cap = max(row_align, (cap // row_align) * row_align)
    if n <= row_align:
        return row_align
    full = max((n // row_align) * row_align, row_align)    # keep blocks within the array
    tile_n = min(cap, full)
    # give a 2-TensorCore part (v7x) >= 2 row tiles when there is enough work
    half = (((n + 1) // 2) // row_align) * row_align
    if half >= row_align:
        tile_n = min(tile_n, half)
    return max(tile_n, row_align)


def cb_loss(pred, target, weight=None, reduction="mean"):
    """Pallas forward of CBLoss(loss_type='sigmoid_focal', gamma=2, loss_weight=1).

    pred/target: (N, C) logits / multi-hot labels; weight: (N,) or None.
    """
    assert reduction in ("none", "mean", "sum")
    n, c = pred.shape
    has_weight = weight is not None

    # ---- tile sizing from actual dtypes / streams -----------------------------
    per_row_bytes = c * (jnp.dtype(pred.dtype).itemsize
                         + jnp.dtype(target.dtype).itemsize)
    if reduction == "none":
        per_row_bytes += c * 4                       # f32 output stream
    if has_weight:
        per_row_bytes += jnp.dtype(weight.dtype).itemsize

    row_align = _row_align(pred.dtype, target.dtype)
    tile_n = _pick_tile_n(n, per_row_bytes, row_align)
    num_tiles = -(-n // tile_n)
    needs_mask = (n % tile_n) != 0

    grid = (num_tiles,)
    # Block last dim == full C: no lane-padding inflation of HBM traffic, no pad copies.
    row_spec = pl.BlockSpec((tile_n, c), lambda i: (i, 0))
    in_specs = [row_spec, row_spec]
    args = [pred, target]
    if has_weight:
        in_specs.append(pl.BlockSpec((tile_n, 1), lambda i: (i, 0)))
        args.append(weight.reshape(n, 1))            # free reshape, no copy

    compiler_params = pltpu.CompilerParams(
        dimension_semantics=("parallel",),           # independent row tiles
        vmem_limit_bytes=_VMEM_LIMIT,
    )

    if reduction == "none":
        kernel = _elem_kernel_w if has_weight else _elem_kernel
        out = pl.pallas_call(
            kernel,
            grid=grid,
            in_specs=in_specs,
            out_specs=pl.BlockSpec((tile_n, c), lambda i: (i, 0)),
            out_shape=jax.ShapeDtypeStruct((n, c), jnp.float32),
            compiler_params=compiler_params,
        )(*args)
        return out if LOSS_WEIGHT == 1.0 else LOSS_WEIGHT * out

    # 'mean' / 'sum': never write the (N, C) loss back to HBM; emit one partial
    # sum per row tile and finish the tiny reduction in XLA (keeps the grid axis
    # fully parallel -- no serialized accumulator).
    kernel_fn = _sum_kernel_w if has_weight else _sum_kernel
    kernel = functools.partial(kernel_fn, n, tile_n, needs_mask)
    psums = pl.pallas_call(
        kernel,
        grid=grid,
        in_specs=in_specs,
        out_specs=pl.BlockSpec((1, 8, 128), lambda i: (i, 0, 0)),
        out_shape=jax.ShapeDtypeStruct((num_tiles, 8, 128), jnp.float32),
        compiler_params=compiler_params,
    )(*args)
    total = jnp.sum(psums[:, 0, 0])
    if reduction == "sum":
        return total if LOSS_WEIGHT == 1.0 else LOSS_WEIGHT * total
    # 'mean': mean over all N*C elements of (loss * weight), per weight_reduce_loss
    mean = total / (n * c)
    return mean if LOSS_WEIGHT == 1.0 else LOSS_WEIGHT * mean


# ---------------- pure-JAX reference -------------------------------------------

def _reference(pred, target, weight=None, reduction="mean"):
    n, c = pred.shape
    x = pred.astype(jnp.float32)
    t = target.astype(jnp.float32)
    if weight is None:
        weight = jnp.ones((n,), jnp.float32)
    w = jnp.repeat(weight.astype(jnp.float32)[:, None], c, axis=1)
    p = jax.nn.sigmoid(x)
    pt = (1.0 - p) * t + p * (1.0 - t)
    fw = (ALPHA * t + (1.0 - ALPHA) * (1.0 - t)) * pt ** GAMMA
    bce = jnp.maximum(x, 0.0) - x * t + jnp.log1p(jnp.exp(-jnp.abs(x)))
    loss = 2.0 * fw * bce * w
    if reduction == "none":
        return LOSS_WEIGHT * loss
    if reduction == "sum":
        return LOSS_WEIGHT * jnp.sum(loss)
    return LOSS_WEIGHT * jnp.mean(loss)


# TODO(synk): loss_type in {'bce','ce','softmax_focal'} branches of CBLoss and the
# avg_factor path of weight_reduce_loss are not implemented; only the default
# 'sigmoid_focal' path is.

if __name__ == "__main__":
    key = jax.random.PRNGKey(0)
    k1, k2, k3 = jax.random.split(key, 3)

    # (8, 32): default small case. (13, 50): N not a multiple of 8 and C not a
    # multiple of 128 -> exercises multi-tile grid, edge-row masking, and the
    # partial edge block on the 'none' output.
    for (N, C) in [(8, 32), (13, 50)]:
        pred = jax.random.normal(jax.random.fold_in(k1, N), (N, C), dtype=jnp.float32) * 2.0
        labels = jax.random.randint(jax.random.fold_in(k2, N), (N,), 0, C)
        target = jax.nn.one_hot(labels, C, dtype=jnp.float32)
        sample_w = jax.random.uniform(jax.random.fold_in(k3, N), (N,), dtype=jnp.float32)

        # default path: reduction='mean', weight=None (no weight stream at all)
        out_mean = jax.block_until_ready(cb_loss(pred, target))
        ref_mean = _reference(pred, target)
        assert jnp.allclose(out_mean, ref_mean, atol=1e-5, rtol=1e-5), (N, C, out_mean, ref_mean)

        # weighted mean
        out_wmean = jax.block_until_ready(cb_loss(pred, target, weight=sample_w))
        ref_wmean = _reference(pred, target, weight=sample_w)
        assert jnp.allclose(out_wmean, ref_wmean, atol=1e-5, rtol=1e-5), (N, C, out_wmean, ref_wmean)

        # sum
        out_sum = jax.block_until_ready(cb_loss(pred, target, reduction="sum"))
        ref_sum = _reference(pred, target, reduction="sum")
        assert jnp.allclose(out_sum, ref_sum, atol=1e-4, rtol=1e-5), (N, C, out_sum, ref_sum)

        # elementwise path (reduction='none')
        out_none = jax.block_until_ready(cb_loss(pred, target, reduction="none"))
        ref_none = _reference(pred, target, reduction="none")
        assert jnp.allclose(out_none, ref_none, atol=1e-5, rtol=1e-5), (N, C)

    print("KERNEL_OK")
</pallas_src>

<mosaic_0001>
module attributes {stable_mosaic.version = 11 : i64} {
  func.func @_sum_kernel(%arg0: i32, %arg1: memref<8x32xf32, #tpu.memory_space<vmem>>, %arg2: memref<8x32xf32, #tpu.memory_space<vmem>>, %arg3: memref<1x8x128xf32, #tpu.memory_space<vmem>>) attributes {dimension_semantics = [#tpu.dimension_semantics<parallel>], iteration_bounds = array<i64: 1>, scalar_prefetch = 0 : i64, scratch_operands = 0 : i64, tpu.core_type = #tpu.core_type<tc>, window_params = [{transform_indices = @transform_0, window_bounds = array<i64: 8, 32>}, {transform_indices = @transform_1, window_bounds = array<i64: 8, 32>}, {transform_indices = @transform_2, window_bounds = array<i64: 1, 8, 128>}]} {
    %c0 = arith.constant 0 : index
    %c0_0 = arith.constant 0 : index
    %0 = vector.load %arg1[%c0, %c0_0] : memref<8x32xf32, #tpu.memory_space<vmem>>, vector<8x32xf32>
    %c0_1 = arith.constant 0 : index
    %c0_2 = arith.constant 0 : index
    %1 = vector.load %arg2[%c0_1, %c0_2] : memref<8x32xf32, #tpu.memory_space<vmem>>, vector<8x32xf32>
    %2 = math.absf %0 : vector<8x32xf32>
    %cst = arith.constant 0.000000e+00 : f32
    %3 = vector.broadcast %cst : f32 to vector<8x32xf32>
    %4 = arith.subf %3, %2 : vector<8x32xf32>
    %5 = math.exp %4 : vector<8x32xf32>
    %cst_3 = arith.constant 1.000000e+00 : f32
    %6 = vector.broadcast %cst_3 : f32 to vector<8x32xf32>
    %7 = arith.addf %6, %5 : vector<8x32xf32>
    %8 = tpu.reciprocal %7 {approx = true} : vector<8x32xf32> -> vector<8x32xf32>
    %9 = arith.mulf %7, %8 : vector<8x32xf32>
    %cst_4 = arith.constant 2.000000e+00 : f32
    %10 = vector.broadcast %cst_4 : f32 to vector<8x32xf32>
    %11 = arith.subf %10, %9 : vector<8x32xf32>
    %12 = arith.mulf %8, %11 : vector<8x32xf32>
    %13 = arith.mulf %7, %12 : vector<8x32xf32>
    %cst_5 = arith.constant 2.000000e+00 : f32
    %14 = vector.broadcast %cst_5 : f32 to vector<8x32xf32>
    %15 = arith.subf %14, %13 : vector<8x32xf32>
    %16 = arith.mulf %12, %15 : vector<8x32xf32>
    %cst_6 = arith.constant 0.000000e+00 : f32
    %17 = vector.broadcast %cst_6 : f32 to vector<8x32xf32>
    %18 = arith.cmpf oge, %0, %17 : vector<8x32xf32>
    %19 = arith.mulf %5, %16 : vector<8x32xf32>
    %20 = arith.select %18, %16, %19 : vector<8x32xi1>, vector<8x32xf32>
    %cst_7 = arith.constant 1.000000e+00 : f32
    %21 = vector.broadcast %cst_7 : f32 to vector<8x32xf32>
    %22 = arith.subf %21, %20 : vector<8x32xf32>
    %23 = arith.mulf %22, %1 : vector<8x32xf32>
    %cst_8 = arith.constant 1.000000e+00 : f32
    %24 = vector.broadcast %cst_8 : f32 to vector<8x32xf32>
    %25 = arith.subf %24, %1 : vector<8x32xf32>
    %26 = arith.mulf %20, %25 : vector<8x32xf32>
    %27 = arith.addf %23, %26 : vector<8x32xf32>
    %cst_9 = arith.constant 0.000000e+00 : f32
    %28 = vector.broadcast %cst_9 : f32 to vector<8x32xf32>
    %29 = arith.maximumf %0, %28 : vector<8x32xf32>
    %30 = arith.mulf %0, %1 : vector<8x32xf32>
    %31 = arith.subf %29, %30 : vector<8x32xf32>
    %32 = math.log1p %5 : vector<8x32xf32>
    %33 = arith.addf %31, %32 : vector<8x32xf32>
    %34 = arith.mulf %27, %27 : vector<8x32xf32>
    %35 = arith.mulf %34, %33 : vector<8x32xf32>
    %cst_10 = arith.constant dense<0.000000e+00> : vector<8xf32>
    %36 = vector.multi_reduction <add>, %35, %cst_10 [1] : vector<8x32xf32> to vector<8xf32>
    %37 = vector.shape_cast %36 : vector<8xf32> to vector<8x1xf32>
    %38 = vector.shape_cast %37 : vector<8x1xf32> to vector<1x8x1xf32>
    %cst_11 = arith.constant dense<0.000000e+00> : vector<1xf32>
    %39 = vector.multi_reduction <add>, %38, %cst_11 [1, 2] : vector<1x8x1xf32> to vector<1xf32>
    %40 = vector.shape_cast %39 : vector<1xf32> to vector<1x1x1xf32>
    %41 = vector.extract %40[0, 0, 0] : f32 from vector<1x1x1xf32>
    %42 = vector.broadcast %41 : f32 to vector<1x8x128xf32>
    %c0_12 = arith.constant 0 : index
    %c0_13 = arith.constant 0 : index
    %c0_14 = arith.constant 0 : index
    %43 = vector.load %arg3[%c0_12, %c0_13, %c0_14] : memref<1x8x128xf32, #tpu.memory_space<vmem>>, vector<1x8x128xf32>
    tpu.vector_store %arg3[%c0_12, %c0_13, %c0_14], %42 {strides = array<i32>} : memref<1x8x128xf32, #tpu.memory_space<vmem>>, vector<1x8x128xf32>,
    return
  }
  func.func @transform_0(%arg0: i32) -> (i32, i32) {
    %c0_i32 = arith.constant 0 : i32
    %c0_i32_0 = arith.constant 0 : i32
    return %arg0, %c0_i32 : i32, i32
  }
  func.func @transform_1(%arg0: i32) -> (i32, i32) {
    %c0_i32 = arith.constant 0 : i32
    %c0_i32_0 = arith.constant 0 : i32
    return %arg0, %c0_i32 : i32, i32
  }
  func.func @transform_2(%arg0: i32) -> (i32, i32, i32) {
    %c0_i32 = arith.constant 0 : i32
    %c0_i32_0 = arith.constant 0 : i32
    %c0_i32_1 = arith.constant 0 : i32
    return %arg0, %c0_i32, %c0_i32_0 : i32, i32, i32
  }
}

</mosaic_0001>

<bundles_post_ra>
// kernel: tpu_custom_call.1
= control target key start
LH: loop header
LB: loop body
LE: loop exit
PB: predicated region body
PF: predicated region fallthrough
CT: control target
= control target key end

     0   :  { %7 = vsyncpa [#allocation3], 0  ;;  %s210_s0 = inlined_call_operand.hbm [shape: f32[8,32], index: 0, kind: input, shape index: {}]   ;;  %s211_s1 = inlined_call_operand.hbm [shape: f32[8,32], index: 1, kind: input, shape index: {}]   ;;  %s212_s2 = inlined_call_operand.hbm [shape: f32[1,8,128], index: 2, kind: output, shape index: {}]  }
   0x1   :  { %8 = vsyncpa [#allocation6], 0 }
   0x2   :  { %9 = vsyncpa [#allocation4], 0  ;;  %s183_s9 = smov [#allocation2]   ;;  %s184_s11 = smov [#allocation5]  }
   0x3   :  { %s16_s10 = sshll.u32 %s183_s9, 4  ;;  %s26_s12 = sshll.u32 %s184_s11, 4  ;;  %s17_s10 = int_to_ptr.vmem [resolvable:$true] %s16_s10  ;;  %s27_s12 = int_to_ptr.vmem [resolvable:$true] %s26_s12 }
   0x4   :  { %s125_s13 = scalar_lea.vmem %s17_s10, 128  ;;  %p130_p1 = scmp.lt.s32.totalorder %s17_s10, %s17_s10 }
   0x5   :  { %p126_p0 = scmp.ne.s32.totalorder %s17_s10, %s125_s13  ;;  %p131_p2 = scmp.lt.s32.totalorder %s125_s13, %s125_s13 }
   0x7   :  { %p132_p3 = por %p131_p2, %p130_p1 }
   0x9   :  { %p133_p4 = pnand %p132_p3, %p126_p0 }
   0xb   :  { %136 = shalt.err (!%p133_p4)
}
   0xc   :  { %19 = dma.hbm_to_vmem [thread:$0]  %s210_s0, 128, %s17_s10, [#allocation3]  }
   0xd   :  { %s145_s16 = scalar_lea.vmem %s27_s12, 128  ;;  %p150_p6 = scmp.lt.s32.totalorder %s27_s12, %s27_s12 }
   0xe   :  { %p146_p5 = scmp.ne.s32.totalorder %s27_s12, %s145_s16  ;;  %p151_p7 = scmp.lt.s32.totalorder %s145_s16, %s145_s16 }
  0x10   :  { %p152_p8 = por %p151_p7, %p150_p6 }
  0x12   :  { %p153_p9 = pnand %p152_p8, %p146_p5 }
  0x14   :  { %156 = shalt.err (!%p153_p9)
}
  0x15   :  { %29 = dma.hbm_to_vmem [thread:$0]  %s211_s1, 128, %s27_s12, [#allocation6]  }
  0x16   :  { %177 = dma.done.wait [#allocation3], 128  }
  0x17   :  { %178 = vsyncadd [#allocation3], 4294967168 }
  0x18   :  { %179 = dma.done.wait [#allocation6], 128  }
  0x19   :  { %180 = vsyncadd [#allocation6], 4294967168  ;;  %v36_v0 = vld [vmem:[#allocation2] sm:$0xff]  ;;  %v37_v12 = vld [vmem:[#allocation5] sm:$0xff]  ;;  %vm73_vm2 = vcmask 261120   ;;  %vm77_vm3 = vcmask 7168  }
  0x1a   :  { %v38_v1 = vand.u32 2147483647, %v36_v0  ;;  %vm50_vm0 = vcmp.ge.f32.partialorder %v36_v0, 0.0  ;;  %v55_v18 = vsub.f32 1.0, %v37_v12  ;;  %v58_v19 = vmax.f32 %v36_v0, 0.0  ;;  %s185_s0 = smov [#allocation7]  }
  0x1b   :  { %v59_v20 = vmul.f32 %v37_v12, %v36_v0  ;;  %s96_s1 = sshll.u32 %s185_s0, 4  ;;  %s97_s1 = int_to_ptr.vmem [resolvable:$true] %s96_s1 }
  0x1c   :  { %v39_v2 = vsub.f32 0.0, %v38_v1  ;;  %s157_s20 = scalar_lea.vmem %s97_s1, 128  ;;  %p162_p11 = scmp.lt.s32.totalorder %s97_s1, %s97_s1 }
  0x1d   :  { %v60_v27 = vsub.f32 %v58_v19, %v59_v20  ;;  %p158_p10 = scmp.ne.s32.totalorder %s97_s1, %s157_s20  ;;  %p163_p12 = scmp.lt.s32.totalorder %s157_s20, %s157_s20 }
  0x1e   :  { %v40_v3 = vmul.f32 1.442695, %v39_v2 }
  0x1f   :  { %p164_p13 = por %p163_p12, %p162_p11 }
  0x20   :  { %111 = vpow2.f32 %v40_v3 }
  0x21   :  { %p165_p0 = pnand %p164_p13, %p158_p10 }
  0x2d   :  { %v112_v4 = vpop.eup %111 }
  0x2e   :  { %v42_v5 = vadd.f32 1.0, %v112_v4  ;;  %v64_v10 = vmul.f32 -0.5, %v112_v4  ;;  %v67_v16 = vand.u32 2147483647, %v112_v4 }
  0x30   :  { %113 = vrcp.f32 %v42_v5  ;;  %v65_v14 = vadd.f32 1.0, %v64_v10  ;;  %vm68_vm1 = vcmp.lt.f32.partialorder %v67_v16, 0.0004427343 }
  0x31   :  { %115 = vlog2.f32 %v42_v5 }
  0x32   :  { %v66_v23 = vmul.f32 %v112_v4, %v65_v14 }
  0x3d   :  { %v114_v6 = vpop.eup %113 }
  0x3e   :  { %v44_v7 = vmul.f32 %v114_v6, %v42_v5  ;;  %v116_v15 = vpop.eup %115 }
  0x3f   :  { %v63_v22 = vmul.f32 0.6931472, %v116_v15 }
  0x40   :  { %v45_v8 = vsub.f32 2.0, %v44_v7 }
  0x41   :  { %v69_v28 = vsel %vm68_vm1, %v66_v23, %v63_v22 }
  0x42   :  { %v46_v9 = vmul.f32 %v114_v6, %v45_v8  ;;  %v70_v31 = vadd.f32 %v69_v28, %v60_v27 }
  0x44   :  { %v47_v11 = vmul.f32 %v46_v9, %v42_v5 }
  0x46   :  { %v48_v13 = vsub.f32 2.0, %v47_v11 }
  0x48   :  { %v49_v17 = vmul.f32 %v48_v13, %v46_v9 }
  0x4a   :  { %v51_v21 = vmul.f32 %v112_v4, %v49_v17 }
  0x4c   :  { %v52_v24 = vsel %vm50_vm0, %v49_v17, %v51_v21 }
  0x4d   :  { %v53_v25 = vsub.f32 1.0, %v52_v24  ;;  %v56_v26 = vmul.f32 %v55_v18, %v52_v24 }
  0x4f   :  { %v54_v29 = vmul.f32 %v53_v25, %v37_v12 }
  0x51   :  { %v57_v30 = vadd.f32 %v56_v26, %v54_v29 }
  0x53   :  { %v71_v32 = vmul.f32 %v57_v30, %v57_v30 }
  0x55   :  { %v72_v33 = vmul.f32 %v71_v32, %v70_v31 }
  0x57   :  { %v74_v34 = vsel %vm73_vm2, %v72_v33, 0.0 }
  0x58   :  { %75 = vadd.xlane.f32.xlu0 %v74_v34 }
  0xe1   :  { %v76_v35 = vpop.xlane.xlu0 %75 }
  0xe2   :  { %v78_v36 = vsel %vm77_vm3, %v76_v35, 0.0 }
  0xe3   :  { %79 = vadd.xlane.f32.xlu0 %v78_v36 }
 0x16c   :  { %v80_v37 = vpop.xlane.xlu0 %79 }
 0x16d   :  { %v81_v38 = vrot.slane %v80_v37, 4 }
 0x16f   :  { %v82_v39 = vadd.f32 %v81_v38, %v80_v37 }
 0x171   :  { %v83_v40 = vrot.slane %v82_v39, 2 }
 0x173   :  { %v84_v41 = vadd.f32 %v83_v40, %v82_v39 }
 0x175   :  { %v85_v42 = vrot.slane %v84_v41, 1 }
 0x177   :  { %v86_v43 = vadd.f32 %v85_v42, %v84_v41 }
 0x179   :  { %106 = vpush %v86_v43 }
 0x1aa   :  { %s107_s19 = spop %106 }
 0x1ab   :  { %v88_v44 = vstv %s107_s19 }
 0x1ac   :  { %89 = vst [vmem:[#allocation7] sm:$0xff] %v88_v44 }
 0x1ad   :  { %168 = shalt.err (!%p165_p0)
}
 0x1ae   :  { %99 = dma.vmem_to_hbm [thread:$0]  %s97_s1, 128, %s212_s2, [#allocation4]  }
 0x1af   :  { %181 = dma.done.wait [#allocation4], 128  }
 0x1b0   :  { %182 = vsyncadd [#allocation4], 4294967168 }
 0x1b1   :  { %103 = vsyncpa [#allocation3], 1 }
 0x1b2   :  { %104 = vsyncpa [#allocation6], 1 }
 0x1b3   :  { %105 = vsyncpa [#allocation4], 1 }

</bundles_post_ra>
